<compile_context>
chip_gen: v7x
topology: tpu7x:2x2x1
jax: 0.10.0
libtpu: 0.0.40
codegen_flags: <defaults>
</compile_context>

<pallas_src>
import jax
import jax.numpy as jnp
from jax.experimental import pallas as pl
from jax.experimental.pallas import tpu as pltpu


def _round_up(v, m):
    return ((v + m - 1) // m) * m


def _custom_nn_beta_kernel(consts_ref, pa_ref, pb_ref, x_ref, out_ref):
    # consts_ref: SMEM (3,) f32  = [bias0, n*params[6], 6*n*n*bias[1]]
    # pa_ref/pb_ref: VMEM (F, 1) = per-feature params (group g -> p[2g] / p[2g+1])
    # x_ref:   VMEM (TB, F)      = batch-major tile, contiguous HBM DMA
    # out_ref: VMEM (1, TB)      = lane-dense output tile
    b0 = consts_ref[0]
    scale = consts_ref[1]     # n * params[6]
    offset = consts_ref[2]    # 6 * n^2 * bias[1]

    # Batch -> lanes so every EUP tanh vreg is lane-dense even for tiny F.
    # (XLU transpose rides in an otherwise-idle slot while the EUP is busy.)
    xt = x_ref[...].T                                   # (F, TB)
    cdt = xt.dtype

    # Two full-slab tanh passes (one per param set); accumulator is seeded from
    # the first pass (no zeros tile + extra add).  For very large n the slab is
    # a VMEM temp that Mosaic reduces tile-wise, so vreg pressure stays bounded.
    part = jnp.tanh(xt * pa_ref[...] + b0.astype(cdt))
    part = part + jnp.tanh(xt * pb_ref[...] + b0.astype(cdt))

    # Single cross-sublane reduce (F rows -> 1), accumulate in f32.
    red = jnp.sum(part.astype(jnp.float32), axis=0, keepdims=True)   # (1, TB)
    out_ref[...] = jax.nn.sigmoid(red * scale + offset)


def custom_nn_beta_forward(x, params, bias, num_labels, *,
                           compute_dtype=jnp.float32,
                           target_tile_bytes=2 * 1024 * 1024,
                           vmem_budget_bytes=24 * 1024 * 1024):
    """Pallas implementation of customNNBeta.forward.

    x: (B, 3*num_labels) -> returns (B,) float32.
    compute_dtype=jnp.bfloat16 is an opt-in fast path for v6e/v7x (halves HBM
    read traffic and EUP work); it will not meet a 1e-5 accuracy tolerance.
    """
    n = int(num_labels)
    B, feat = x.shape
    assert feat == 3 * n, f"expected {3 * n} features, got {feat}"
    params = params.astype(jnp.float32)
    bias = bias.astype(jnp.float32)
    x = x.astype(compute_dtype)
    itemsize = jnp.dtype(compute_dtype).itemsize

    # ---- batch-tile sizing: bytes target, VMEM aware, >=2 steps for v7x's 2 TCs.
    lane_pad = _round_up(feat, 128)                 # VMEM lane footprint of the x tile
    # Per-batch-row VMEM bytes: double-buffered input tile (lane padded) +
    # transposed copy and ~two elementwise temps + double-buffered output row.
    row_bytes = 2 * lane_pad * itemsize + 3 * _round_up(feat, 8) * itemsize + 2 * 4
    tb = _round_up(pl.cdiv(target_tile_bytes, feat * itemsize), 128)   # bytes-target tile
    tb = min(tb, max(128, (vmem_budget_bytes // row_bytes) // 128 * 128))  # VMEM cap
    b128 = _round_up(B, 128)
    tb = min(tb, b128)
    if b128 >= 256:                                  # keep >=2 grid steps (megacore)
        tb = min(tb, _round_up(pl.cdiv(b128, 2), 128))
    b_pad = _round_up(B, tb)
    # TODO(synk): for extremely large num_labels the feature axis itself would
    # need tiling; not required for the shapes this module targets.

    if b_pad != B:
        # Only batch rows are padded (zeros); padded output lanes are sliced off.
        x = jnp.pad(x, ((0, b_pad - B), (0, 0)))

    # Per-feature parameter columns: feature c of group g = c // n pairs with
    # params[2g] (i-role) and params[2g+1] (j-role) in the original double loop.
    pa_col = jnp.repeat(params[jnp.array([0, 2, 4])], n).reshape(feat, 1).astype(compute_dtype)
    pb_col = jnp.repeat(params[jnp.array([1, 3, 5])], n).reshape(feat, 1).astype(compute_dtype)
    # Fold the closed-form scale/offset into scalars staged once to SMEM.
    consts = jnp.stack([bias[0],
                        jnp.float32(n) * params[6],
                        jnp.float32(6 * n * n) * bias[1]])

    grid = (b_pad // tb,)
    cost = pl.CostEstimate(
        flops=6 * feat * b_pad,
        transcendentals=2 * feat * b_pad,
        bytes_accessed=b_pad * feat * itemsize + b_pad * 4,
    )

    out = pl.pallas_call(
        _custom_nn_beta_kernel,
        out_shape=jax.ShapeDtypeStruct((1, b_pad), jnp.float32),
        grid=grid,
        in_specs=[
            pl.BlockSpec(memory_space=pltpu.MemorySpace.SMEM),   # consts (3,)
            pl.BlockSpec((feat, 1), lambda i: (0, 0)),           # pa_col (fetched once)
            pl.BlockSpec((feat, 1), lambda i: (0, 0)),           # pb_col
            pl.BlockSpec((tb, feat), lambda i: (i, 0)),          # x tile, natural layout
        ],
        out_specs=pl.BlockSpec((1, tb), lambda i: (0, i)),       # lane-dense output
        compiler_params=pltpu.CompilerParams(
            dimension_semantics=("parallel",),
            vmem_limit_bytes=32 * 1024 * 1024,
        ),
        cost_estimate=cost,
    )(consts, pa_col, pb_col, x)

    return out[0, :B]


def _reference_forward(x, params, bias, num_labels):
    # Literal translation of the PyTorch double loop, for verification only.
    n = num_labels
    accs = []
    for i in range(n):
        for j in range(n):
            info = [x[:, i], x[:, j], x[:, n + i], x[:, n + j],
                    x[:, 2 * n + i], x[:, 2 * n + j]]
            for k in range(6):
                accs.append(jnp.tanh(info[k] * params[k] + bias[0]) * params[-1] + bias[1])
    stacked = jnp.stack(accs, axis=0).T   # == torch.vstack(accs).permute(1, 0)
    return jax.nn.sigmoid(stacked.sum(axis=1))


if __name__ == "__main__":
    num_labels = 4
    feat = 3 * num_labels

    # Deterministic parameter init, exactly as in customLayer.__init__:
    params = 0.5 * jnp.ones((7,), dtype=jnp.float32)
    bias = jnp.zeros((2,), dtype=jnp.float32)

    key = jax.random.PRNGKey(0)
    k_small, k_big = jax.random.split(key)

    # Small case matching the module's intended shapes (batch=4, num_labels=4).
    x_small = jax.random.normal(k_small, (4, feat), dtype=jnp.float32)
    out_small = jax.block_until_ready(
        custom_nn_beta_forward(x_small, params, bias, num_labels))
    ref_small = _reference_forward(x_small, params, bias, num_labels)
    assert out_small.shape == (4,)
    assert jnp.allclose(out_small, ref_small, atol=1e-5, rtol=1e-5), (out_small, ref_small)

    # Larger, non-aligned batch: exercises multi-step grid + batch-row padding.
    x_big = jax.random.normal(k_big, (300, feat), dtype=jnp.float32)
    out_big = jax.block_until_ready(
        custom_nn_beta_forward(x_big, params, bias, num_labels))
    ref_big = _reference_forward(x_big, params, bias, num_labels)
    assert out_big.shape == (300,)
    assert jnp.allclose(out_big, ref_big, atol=1e-5, rtol=1e-5)

    print("KERNEL_OK")
</pallas_src>

<mosaic_0001>
module attributes {stable_mosaic.version = 11 : i64} {
  func.func @_custom_nn_beta_kernel(%arg0: i32, %arg1: memref<3xf32, #tpu.memory_space<smem>>, %arg2: memref<12x1xf32, #tpu.memory_space<vmem>>, %arg3: memref<12x1xf32, #tpu.memory_space<vmem>>, %arg4: memref<128x12xf32, #tpu.memory_space<vmem>>, %arg5: memref<1x128xf32, #tpu.memory_space<vmem>>) attributes {dimension_semantics = [#tpu.dimension_semantics<parallel>], iteration_bounds = array<i64: 1>, scalar_prefetch = 0 : i64, scratch_operands = 0 : i64, tpu.core_type = #tpu.core_type<tc>, window_params = [{transform_indices = @transform_0, window_bounds = array<i64: 3>}, {pipeline_mode = #tpu.pipeline_mode<synchronous>, transform_indices = @transform_1, window_bounds = array<i64: 12, 1>}, {pipeline_mode = #tpu.pipeline_mode<synchronous>, transform_indices = @transform_2, window_bounds = array<i64: 12, 1>}, {transform_indices = @transform_3, window_bounds = array<i64: 128, 12>}, {transform_indices = @transform_4, window_bounds = array<i64: 1, 128>}]} {
    %c0 = arith.constant 0 : index
    %0 = memref.load %arg1[%c0] : memref<3xf32, #tpu.memory_space<smem>>
    %c1 = arith.constant 1 : index
    %1 = memref.load %arg1[%c1] : memref<3xf32, #tpu.memory_space<smem>>
    %c2 = arith.constant 2 : index
    %2 = memref.load %arg1[%c2] : memref<3xf32, #tpu.memory_space<smem>>
    %c0_0 = arith.constant 0 : index
    %c0_1 = arith.constant 0 : index
    %3 = vector.load %arg4[%c0_0, %c0_1] : memref<128x12xf32, #tpu.memory_space<vmem>>, vector<128x12xf32>
    %4 = tpu.transpose %3, [1, 0] : vector<128x12xf32> -> vector<12x128xf32>
    %c0_2 = arith.constant 0 : index
    %c0_3 = arith.constant 0 : index
    %5 = vector.load %arg2[%c0_2, %c0_3] : memref<12x1xf32, #tpu.memory_space<vmem>>, vector<12x1xf32>
    %6 = vector.broadcast %5 : vector<12x1xf32> to vector<12x128xf32>
    %7 = arith.mulf %4, %6 : vector<12x128xf32>
    %8 = vector.broadcast %0 : f32 to vector<12x128xf32>
    %9 = arith.addf %7, %8 : vector<12x128xf32>
    %10 = math.tanh %9 : vector<12x128xf32>
    %c0_4 = arith.constant 0 : index
    %c0_5 = arith.constant 0 : index
    %11 = vector.load %arg3[%c0_4, %c0_5] : memref<12x1xf32, #tpu.memory_space<vmem>>, vector<12x1xf32>
    %12 = vector.broadcast %11 : vector<12x1xf32> to vector<12x128xf32>
    %13 = arith.mulf %4, %12 : vector<12x128xf32>
    %14 = vector.broadcast %0 : f32 to vector<12x128xf32>
    %15 = arith.addf %13, %14 : vector<12x128xf32>
    %16 = math.tanh %15 : vector<12x128xf32>
    %17 = arith.addf %10, %16 : vector<12x128xf32>
    %cst = arith.constant dense<0.000000e+00> : vector<128xf32>
    %18 = vector.multi_reduction <add>, %17, %cst [0] : vector<12x128xf32> to vector<128xf32>
    %19 = vector.shape_cast %18 : vector<128xf32> to vector<1x128xf32>
    %20 = vector.broadcast %1 : f32 to vector<1x128xf32>
    %21 = arith.mulf %19, %20 : vector<1x128xf32>
    %22 = vector.broadcast %2 : f32 to vector<1x128xf32>
    %23 = arith.addf %21, %22 : vector<1x128xf32>
    %24 = arith.negf %23 : vector<1x128xf32>
    %25 = math.exp %24 : vector<1x128xf32>
    %cst_6 = arith.constant 1.000000e+00 : f32
    %26 = vector.broadcast %cst_6 : f32 to vector<1x128xf32>
    %27 = arith.addf %26, %25 : vector<1x128xf32>
    %28 = arith.divf %26, %27 : vector<1x128xf32>
    %c0_7 = arith.constant 0 : index
    %c0_8 = arith.constant 0 : index
    %29 = vector.load %arg5[%c0_7, %c0_8] : memref<1x128xf32, #tpu.memory_space<vmem>>, vector<1x128xf32>
    tpu.vector_store %arg5[%c0_7, %c0_8], %28 {strides = array<i32>} : memref<1x128xf32, #tpu.memory_space<vmem>>, vector<1x128xf32>,
    return
  }
  func.func @transform_0(%arg0: i32) -> i32 {
    %c0_i32 = arith.constant 0 : i32
    %c0_i32_0 = arith.constant 0 : i32
    return %c0_i32 : i32
  }
  func.func @transform_1(%arg0: i32) -> (i32, i32) {
    %c0_i32 = arith.constant 0 : i32
    %c0_i32_0 = arith.constant 0 : i32
    %c0_i32_1 = arith.constant 0 : i32
    return %c0_i32, %c0_i32_0 : i32, i32
  }
  func.func @transform_2(%arg0: i32) -> (i32, i32) {
    %c0_i32 = arith.constant 0 : i32
    %c0_i32_0 = arith.constant 0 : i32
    %c0_i32_1 = arith.constant 0 : i32
    return %c0_i32, %c0_i32_0 : i32, i32
  }
  func.func @transform_3(%arg0: i32) -> (i32, i32) {
    %c0_i32 = arith.constant 0 : i32
    %c0_i32_0 = arith.constant 0 : i32
    return %arg0, %c0_i32 : i32, i32
  }
  func.func @transform_4(%arg0: i32) -> (i32, i32) {
    %c0_i32 = arith.constant 0 : i32
    %c0_i32_0 = arith.constant 0 : i32
    return %c0_i32, %arg0 : i32, i32
  }
}

</mosaic_0001>

<bundles_post_ra>
// kernel: tpu_custom_call.1
= control target key start
LH: loop header
LB: loop body
LE: loop exit
PB: predicated region body
PF: predicated region fallthrough
CT: control target
= control target key end

     0   :  { %9 = vsyncpa [#allocation4], 0  ;;  %s317_s0 = inlined_call_operand.vmem [shape: f32[3], index: 0, kind: input, shape index: {}]   ;;  %s318_s1 = inlined_call_operand.vmem [shape: f32[12,1], index: 1, kind: input, shape index: {}]   ;;  %s319_s2 = inlined_call_operand.vmem [shape: f32[12,1], index: 2, kind: input, shape index: {}]   ;;  %s320_s3 = inlined_call_operand.vmem [shape: f32[128,12], index: 3, kind: input, shape index: {}]   ;;  %s321_s4 = inlined_call_operand.hbm [shape: f32[1,128], index: 4, kind: output, shape index: {}]  }
   0x1   :  { %10 = vsyncpa [#allocation3], 0  ;;  %s17_s17 = sshll.u32 %s317_s0, 4  ;;  %s18_s17 = int_to_ptr.vmem [resolvable:$true] %s17_s17 }
   0x2   :  { %s176_s18 = scalar_lea.vmem %s18_s17, 16  ;;  %p181_p1 = scmp.lt.s32.totalorder %s18_s17, %s18_s17 }
   0x3   :  { %p177_p0 = scmp.ne.s32.totalorder %s18_s17, %s176_s18  ;;  %p182_p2 = scmp.lt.s32.totalorder %s176_s18, %s176_s18 }
   0x5   :  { %p183_p3 = por %p182_p2, %p181_p1 }
   0x7   :  { %p184_p4 = pnand %p183_p3, %p177_p0 }
   0x9   :  { %187 = shalt.err (!%p184_p4)
}
   0xa   :  { %s214_s19 = smov [#allocation2]  }
   0xb   :  { %20 = dma.vmem_to_smem %s18_s17, 16, %s214_s19, [#allocation4]  }
   0xc   :  { %210 = dma.done.wait [#allocation4], 16  }
   0xd   :  { %211 = vsyncadd [#allocation4], 4294967280 }
   0xe   :  { %30 = sfence }
   0xf   :  { %v83_v0 = vld [vmem:[%s318_s1 + $0x8] sm:$0xf]  ;;  %v82_v1 = vld [vmem:[%s318_s1] sm:$0xff]  ;;  %v215_v2 = vmov 0   ;;  %v36_v7 = vld [vmem:[%s320_s3 + $0x10] sm:$0xff]  ;;  %s31_s29 = sld [smem:[#allocation2]] }
  0x10   :  { %162 = vset.pattern.permute.xlu0 %v215_v2  ;;  %163 = vset.pattern.permute.xlu1 %v215_v2  ;;  %v102_v3 = vld [vmem:[%s319_s2 + $0x8] sm:$0xf]  ;;  %v101_v4 = vld [vmem:[%s319_s2] sm:$0xff]  ;;  %v37_v8 = vld [vmem:[%s320_s3 + $0x18] sm:$0xff]  ;;  %vm121_vm0 = vcmask 1043456   ;;  %s157_s30 = sld [smem:[#allocation2 + $0x2]] }
  0x11   :  { %91 = vperm.xlu0 %162, %v83_v0   ;;  %86 = vperm.xlu1 %163, %v82_v1   ;;  %v34_v5 = vld [vmem:[%s320_s3] sm:$0xff]  ;;  %v35_v6 = vld [vmem:[%s320_s3 + $0x8] sm:$0xff]  ;;  %v40_v11 = vld [vmem:[%s320_s3 + $0x30] sm:$0xff]  ;;  %s216_s5 = smov [#allocation5]  }
  0x12   :  { %v38_v9 = vld [vmem:[%s320_s3 + $0x20] sm:$0xff]  ;;  %v39_v10 = vld [vmem:[%s320_s3 + $0x28] sm:$0xff]  ;;  %v41_v12 = vld [vmem:[%s320_s3 + $0x38] sm:$0xff]  ;;  %s147_s6 = sshll.u32 %s216_s5, 4  ;;  %s148_s6 = int_to_ptr.vmem [resolvable:$true] %s147_s6 }
  0x13   :  { %v42_v13 = vld [vmem:[%s320_s3 + $0x40] sm:$0xff]  ;;  %v43_v14 = vld [vmem:[%s320_s3 + $0x48] sm:$0xff]  ;;  %v44_v15 = vld [vmem:[%s320_s3 + $0x50] sm:$0xff]  ;;  %s188_s7 = scalar_lea.vmem %s148_s6, 16  ;;  %s192_s2 = scalar_lea.vmem %s148_s6, 32 }
  0x14   :  { %v45_v16 = vld [vmem:[%s320_s3 + $0x58] sm:$0xff]  ;;  %v46_v17 = vld [vmem:[%s320_s3 + $0x60] sm:$0xff]  ;;  %v47_v18 = vld [vmem:[%s320_s3 + $0x68] sm:$0xff]  ;;  %p189_p5 = scmp.ne.s32.totalorder %s148_s6, %s188_s7  ;;  %p193_p6 = scmp.lt.s32.totalorder %s148_s6, %s148_s6 }
  0x15   :  { %110 = vperm.xlu0 %162, %v102_v3   ;;  %105 = vperm.xlu1 %163, %v101_v4   ;;  %v48_v19 = vld [vmem:[%s320_s3 + $0x70] sm:$0xff]  ;;  %v49_v20 = vld [vmem:[%s320_s3 + $0x78] sm:$0xff]  ;;  %v96_v26 = vstv %s31_s29  ;;  %s156_s3 = sld [smem:[#allocation2 + $0x1]]  ;;  %p194_p7 = scmp.lt.s32.totalorder %s192_s2, %s188_s7 }
  0x16   :  { %v132_v51 = vstv %s157_s30 }
  0x17   :  { %p195_p8 = por %p194_p7, %p193_p6 }
  0x19   :  { %p196_p9 = pnand %p195_p8, %p189_p5 }
  0x1b   :  { %v130_v49 = vstv %s156_s3 }
  0x33   :  { %50 = vxpose.xlu0.b32.start [1/16] (narrow) %v34_v5, 16 }
  0x37   :  { %51 = vxpose.xlu0.b32.cont [2/16] (narrow) %v35_v6, 16 }
  0x3b   :  { %52 = vxpose.xlu0.b32.cont [3/16] (narrow) %v36_v7, 16 }
  0x3f   :  { %53 = vxpose.xlu0.b32.cont [4/16] (narrow) %v37_v8, 16 }
  0x43   :  { %54 = vxpose.xlu0.b32.cont [5/16] (narrow) %v38_v9, 16 }
  0x47   :  { %55 = vxpose.xlu0.b32.cont [6/16] (narrow) %v39_v10, 16 }
  0x4b   :  { %56 = vxpose.xlu0.b32.cont [7/16] (narrow) %v40_v11, 16 }
  0x4f   :  { %57 = vxpose.xlu0.b32.cont [8/16] (narrow) %v41_v12, 16 }
  0x53   :  { %58 = vxpose.xlu0.b32.cont [9/16] (narrow) %v42_v13, 16 }
  0x57   :  { %59 = vxpose.xlu0.b32.cont [10/16] (narrow) %v43_v14, 16 }
  0x5b   :  { %60 = vxpose.xlu0.b32.cont [11/16] (narrow) %v44_v15, 16 }
  0x5f   :  { %61 = vxpose.xlu0.b32.cont [12/16] (narrow) %v45_v16, 16 }
  0x63   :  { %62 = vxpose.xlu0.b32.cont [13/16] (narrow) %v46_v17, 16 }
  0x67   :  { %63 = vxpose.xlu0.b32.cont [14/16] (narrow) %v47_v18, 16 }
  0x6b   :  { %64 = vxpose.xlu0.b32.cont [15/16] (narrow) %v48_v19, 16 }
  0x6f   :  { %65 = vxpose.xlu0.b32.end [16/16] (narrow) %v49_v20, 16 }
  0x90   :  { %v92_v21 = vpop.permute.xlu0 %91  ;;  %v87_v22 = vpop.permute.xlu1 %86 }
  0x94   :  { %v111_v23 = vpop.permute.xlu0 %110  ;;  %v106_v24 = vpop.permute.xlu1 %105 }
  0xb3   :  { %v66_v25 = vpop.trf.xlu0 }
  0xb4   :  { %v94_v27 = vmul.f32 %v87_v22, %v66_v25  ;;  %v113_v28 = vmul.f32 %v106_v24, %v66_v25 }
  0xb6   :  { %v97_v29 = vadd.f32 %v96_v26, %v94_v27  ;;  %v115_v30 = vadd.f32 %v113_v28, %v96_v26 }
  0xb7   :  { %v67_v31 = vpop.trf.xlu0 }
  0xb8   :  { %v95_v32 = vmul.f32 %v92_v21, %v67_v31  ;;  %v114_v33 = vmul.f32 %v111_v23, %v67_v31  ;;  %164 = vtanh.f32 %v97_v29 }
  0xb9   :  { %166 = vtanh.f32 %v115_v30 }
  0xba   :  { %v98_v34 = vadd.f32 %v96_v26, %v95_v32  ;;  %v116_v35 = vadd.f32 %v114_v33, %v96_v26 }
  0xbc   :  { %168 = vtanh.f32 %v98_v34 }
  0xbd   :  { %170 = vtanh.f32 %v116_v35 }
  0xc2   :  { %v165_v36 = vpop.eup %164 }
  0xc3   :  { %v167_v37 = vpop.eup %166 }
  0xc4   :  { %v119_v41 = vadd.f32 %v167_v37, %v165_v36 }
  0xc6   :  { %v169_v38 = vpop.eup %168 }
  0xc7   :  { %v171_v39 = vpop.eup %170 }
  0xc8   :  { %v120_v40 = vadd.f32 %v171_v39, %v169_v38 }
  0xca   :  { %v122_v42 = vsel %vm121_vm0, %v120_v40, 0.0 }
  0xcb   :  { %v123_v43 = vadd.f32 %v122_v42, %v119_v41 }
  0xcd   :  { %v124_v44 = vrot.slane %v123_v43, 4 }
  0xcf   :  { %v125_v45 = vadd.f32 %v124_v44, %v123_v43 }
  0xd1   :  { %v126_v46 = vrot.slane %v125_v45, 2 }
  0xd3   :  { %v127_v47 = vadd.f32 %v126_v46, %v125_v45 }
  0xd5   :  { %v128_v48 = vrot.slane %v127_v47, 1 }
  0xd7   :  { %v129_v50 = vadd.f32 %v128_v48, %v127_v47 }
  0xd9   :  { %v131_v52 = vmul.f32 %v130_v49, %v129_v50 }
  0xdb   :  { %v133_v53 = vadd.f32 %v132_v51, %v131_v52 }
  0xdd   :  { %v158_v54 = vmul.f32 -1.442695, %v133_v53 }
  0xdf   :  { %172 = vpow2.f32 %v158_v54 }
  0xe9   :  { %v173_v55 = vpop.eup %172 }
  0xea   :  { %v137_v56 = vadd.f32 1.0, %v173_v55 }
  0xec   :  { %174 = vrcp.f32 %v137_v56 }
  0xf6   :  { %v175_v57 = vpop.eup %174 }
  0xf7   :  { %140 = vst [vmem:[#allocation5] sm:$0x1] %v175_v57 }
  0xf8   :  { %199 = shalt.err (!%p196_p9)
}
  0xf9   :  { %s200_s10 = scalar_lea.hbm %s321_s4, 16 }
  0xfa   :  { %p201_p10 = scmp.ne.s32.totalorder %s321_s4, %s200_s10  ;;  %p204_p11 = scmp.lt.u32.totalorder %s200_s10, %s321_s4 }
  0xfc   :  { %p206_p12 = pnand %p204_p11, %p201_p10 }
  0xfe   :  { %209 = shalt.err (!%p206_p12)
}
  0xff   :  { %150 = dma.vmem_to_hbm [thread:$0]  %s148_s6, 16, %s321_s4, [#allocation3]  }
 0x100   :  { %212 = dma.done.wait [#allocation3], 16  }
 0x101   :  { %213 = vsyncadd [#allocation3], 4294967280 }
 0x102   :  { %154 = vsyncpa [#allocation3], 1 }
 0x103   :  { %155 = vsyncpa [#allocation4], 1 }

</bundles_post_ra>
